<compile_context>
chip_gen: v7x
topology: tpu7x:2x2x1
jax: 0.10.0
libtpu: 0.0.40
codegen_flags: <defaults>
</compile_context>

<pallas_src>
import functools

import jax
import jax.numpy as jnp
import numpy as np
from jax.experimental import pallas as pl
from jax.experimental.pallas import tpu as pltpu


def _round_up(x, m):
    return ((x + m - 1) // m) * m


def _padding_for(k):
    # Mirrors the module: odd -> symmetric (k-1)/2, even -> (k/2, k/2 - 1).
    if k % 2 != 0:
        return (k - 1) // 2, (k - 1) // 2
    return k // 2, k // 2 - 1


def _fold_params(conv_params, fc_w, fc_b, sizes, lane_pad=128):
    """Fold conv weights/biases through the FC layer.

    Valid because there is no activation between the convs and the FC.
    Returns:
      w_stacked: (n_off*E, T_pad) f32 — per-sequence-offset fused weights.
      bias:      (1, T_pad) f32 — fc_b + sum_k conv_bias_k @ fc_slice_k.
      max_left, max_right, n_off: padding geometry.
    """
    E = conv_params[0][0].shape[1]
    T = fc_w.shape[1]
    T_pad = _round_up(T, lane_pad)
    pads = [_padding_for(k) for k in sizes]
    max_left = max(p[0] for p in pads)
    max_right = max(p[1] for p in pads)
    n_off = max_left + max_right + 1

    w_stacked = jnp.zeros((n_off * E, T_pad), jnp.float32)
    bias = jnp.zeros((1, T_pad), jnp.float32)
    bias = bias.at[0, :T].add(fc_b[0])

    row = 0
    for (w, b), k, (pad_l, _pad_r) in zip(conv_params, sizes, pads):
        c = w.shape[-1]
        fc_slice = fc_w[row:row + c, :]                  # (C, T)
        row += c
        bias = bias.at[0, :T].add((b @ fc_slice)[0])     # fold conv bias
        for j in range(k):
            slot = j - pad_l + max_left                  # sequence-offset slot
            w_eff = w[j] @ fc_slice                      # (E, T)
            w_stacked = w_stacked.at[slot * E:(slot + 1) * E, :T].add(w_eff)
    return w_stacked, bias, max_left, max_right, n_off


def _cnn_kernel(n_off, seq_len, bt, tok_ref, emb_ref, w_ref, b_ref, out_ref):
    """One batch-tile of the fully fused embed + conv + FC.

    tok_ref: (bt*L_padA, 1) int32   padded tokens (-1 marks "same"-pad positions)
    emb_ref: (V_pad, E)             vocab table (compute dtype)
    w_ref:   (n_off*E, T_pad)       fused per-offset weights (compute dtype)
    b_ref:   (1, T_pad)             folded bias (f32)
    out_ref: (bt*L, T_pad)          logits slab (f32), lane-dense
    """
    l_pad = tok_ref.shape[0] // bt
    v_pad, emb_dim = emb_ref.shape
    compute_dtype = emb_ref.dtype

    # Embedding gather as a one-hot MXU matmul. Padding tokens are -1 -> all-zero
    # one-hot row -> zero embedding, which fuses "same" zero-padding into the gather.
    vocab_iota = jax.lax.broadcasted_iota(jnp.int32, (bt * l_pad, v_pad), 1)
    one_hot = jnp.where(tok_ref[...] == vocab_iota,
                        jnp.ones((), compute_dtype),
                        jnp.zeros((), compute_dtype))
    emb_pad = jnp.dot(one_hot, emb_ref[...],
                      preferred_element_type=jnp.float32).astype(compute_dtype)
    xp = emb_pad.reshape(bt, l_pad, emb_dim)             # sublane-aligned split

    # im2col over the n_off distinct sequence offsets -> (bt, L, n_off*E).
    windows = jnp.concatenate(
        [xp[:, o:o + seq_len, :] for o in range(n_off)], axis=-1)
    rows = windows.reshape(bt * seq_len, n_off * emb_dim)  # (bt*L, K)

    logits = jnp.dot(rows, w_ref[...],
                     preferred_element_type=jnp.float32)   # (bt*L, T_pad)
    out_ref[...] = (logits + b_ref[...]).astype(out_ref.dtype)


def cnn_forward(tokens, emb_table, conv_params, fc_w, fc_b, sizes,
                compute_dtype=jnp.bfloat16, batch_tile=None):
    """tokens: (B, L) int32. Returns (B, L, numTags) float32."""
    B, L = tokens.shape
    V, E = emb_table.shape
    T = fc_w.shape[1]

    # Fold conv + FC parameters (wrapper-side, one-time algebra).
    w_stacked, bias, max_left, max_right, n_off = _fold_params(
        conv_params, fc_w, fc_b, sizes)
    w_stacked = w_stacked.astype(compute_dtype)
    T_pad = w_stacked.shape[1]

    # Pad the vocab table rows to a sublane multiple; cast to the MXU dtype.
    V_pad = _round_up(V, 8)
    emb_tab = jnp.zeros((V_pad, E), compute_dtype)
    emb_tab = emb_tab.at[:V].set(emb_table.astype(compute_dtype))

    # Pad the token sequence: max_left/-right for "same" conv padding, plus extra
    # so the padded length is a multiple of 8 (keeps in-kernel reshapes tile-aligned).
    # Pad value -1 never matches the vocab iota -> zero embedding.
    L_pad = max_left + L + max_right
    L_padA = _round_up(L_pad, 8)
    tok_padded = jnp.pad(tokens.astype(jnp.int32),
                         ((0, 0), (max_left, max_right + (L_padA - L_pad))),
                         constant_values=-1)
    tok_col = tok_padded.reshape(B * L_padA, 1)

    bt = B if batch_tile is None else batch_tile
    assert B % bt == 0, "batch_tile must divide the batch"
    nb = B // bt
    if nb > 1:
        assert (bt * L) % 8 == 0, "batch_tile*L must be a multiple of 8 when tiling"

    kernel = functools.partial(_cnn_kernel, n_off, L, bt)
    out = pl.pallas_call(
        kernel,
        out_shape=jax.ShapeDtypeStruct((B * L, T_pad), jnp.float32),
        grid=(nb,),
        in_specs=[
            pl.BlockSpec((bt * L_padA, 1), lambda i: (i, 0)),
            pl.BlockSpec((V_pad, E), lambda i: (0, 0)),
            pl.BlockSpec((n_off * E, T_pad), lambda i: (0, 0)),
            pl.BlockSpec((1, T_pad), lambda i: (0, 0)),
        ],
        out_specs=pl.BlockSpec((bt * L, T_pad), lambda i: (i, 0)),
        compiler_params=pltpu.CompilerParams(
            dimension_semantics=("parallel",)),
    )(tok_col, emb_tab, w_stacked, bias)

    return out[:, :T].reshape(B, L, T)


def reference_forward(tokens, emb_table, conv_params, fc_w, fc_b, sizes):
    """Pure-JAX f32 reference with identical semantics (for verification)."""
    B, L = tokens.shape
    emb = jnp.take(emb_table, tokens, axis=0)
    feats = []
    for (w, b), k in zip(conv_params, sizes):
        pad_l, pad_r = _padding_for(k)
        xp = jnp.pad(emb, ((0, 0), (pad_l, pad_r), (0, 0)))
        acc = jnp.zeros((B, L, w.shape[-1]), jnp.float32)
        for j in range(k):
            acc = acc + jnp.einsum('ble,ec->blc', xp[:, j:j + L, :], w[j])
        feats.append(acc + b)
    hidden = jnp.concatenate(feats, axis=-1)
    return jnp.einsum('blh,ht->blt', hidden, fc_w) + fc_b


if __name__ == "__main__":
    # Config implied by the module: embeddingSize, hiddenSize, featureLen.
    vocab_size = 50        # len(wordDict)
    embedding_size = 16    # config['model']['embeddingSize']
    hidden_size = 48       # config['model']['hiddenSize']
    feature_len = 3        # config['model']['featureLen']
    num_tags = 8           # len(tagDict)
    batch = 2
    seq_len = 8

    sizes = list(range(2, 2 + feature_len))          # kernel heights 2,3,4
    c_out = hidden_size // feature_len               # out_channels per conv

    key = jax.random.PRNGKey(0)
    k_emb, k_tok, k_fc_w, k_fc_b, *k_convs = jax.random.split(key, 4 + 2 * feature_len)

    emb_table = jax.random.normal(k_emb, (vocab_size, embedding_size), jnp.float32) * 0.1
    tokens = jax.random.randint(k_tok, (batch, seq_len), 0, vocab_size, jnp.int32)

    conv_params = []
    for i, k_sz in enumerate(sizes):
        kw, kb = k_convs[2 * i], k_convs[2 * i + 1]
        w = jax.random.normal(kw, (k_sz, embedding_size, c_out), jnp.float32) * 0.05
        b = jax.random.normal(kb, (1, c_out), jnp.float32) * 0.01
        conv_params.append((w, b))

    fc_w = jax.random.normal(k_fc_w, (hidden_size, num_tags), jnp.float32) * 0.05
    fc_b = jax.random.normal(k_fc_b, (1, num_tags), jnp.float32) * 0.01

    ref = reference_forward(tokens, emb_table, conv_params, fc_w, fc_b, sizes)
    ref = jax.block_until_ready(ref)

    # f32 path: tight check of the fused-kernel algebra (gather + fold are exact).
    out_f32 = cnn_forward(tokens, emb_table, conv_params, fc_w, fc_b, sizes,
                          compute_dtype=jnp.float32)
    out_f32 = jax.block_until_ready(out_f32)
    assert out_f32.shape == (batch, seq_len, num_tags)
    np.testing.assert_allclose(np.asarray(out_f32), np.asarray(ref),
                               rtol=1e-4, atol=1e-5)

    # bf16 path (default / perf path): f32 accumulation, looser tolerance.
    out_bf16 = cnn_forward(tokens, emb_table, conv_params, fc_w, fc_b, sizes)
    out_bf16 = jax.block_until_ready(out_bf16)
    assert out_bf16.shape == (batch, seq_len, num_tags)
    np.testing.assert_allclose(np.asarray(out_bf16), np.asarray(ref),
                               rtol=2e-2, atol=2e-3)

    print("KERNEL_OK")
</pallas_src>

<mosaic_0001>
module attributes {stable_mosaic.version = 11 : i64} {
  func.func @_cnn_kernel(%arg0: i32, %arg1: memref<32x1xi32, #tpu.memory_space<vmem>>, %arg2: memref<56x16xf32, #tpu.memory_space<vmem>>, %arg3: memref<64x128xf32, #tpu.memory_space<vmem>>, %arg4: memref<1x128xf32, #tpu.memory_space<vmem>>, %arg5: memref<16x128xf32, #tpu.memory_space<vmem>>) attributes {dimension_semantics = [#tpu.dimension_semantics<parallel>], iteration_bounds = array<i64: 1>, scalar_prefetch = 0 : i64, scratch_operands = 0 : i64, tpu.core_type = #tpu.core_type<tc>, window_params = [{transform_indices = @transform_0, window_bounds = array<i64: 32, 1>}, {pipeline_mode = #tpu.pipeline_mode<synchronous>, transform_indices = @transform_1, window_bounds = array<i64: 56, 16>}, {pipeline_mode = #tpu.pipeline_mode<synchronous>, transform_indices = @transform_2, window_bounds = array<i64: 64, 128>}, {pipeline_mode = #tpu.pipeline_mode<synchronous>, transform_indices = @transform_3, window_bounds = array<i64: 1, 128>}, {transform_indices = @transform_4, window_bounds = array<i64: 16, 128>}]} {
    %0 = tpu.iota {dimensions = array<i32: 1>} : vector<32x56xi32>
    %c0 = arith.constant 0 : index
    %c0_0 = arith.constant 0 : index
    %1 = vector.load %arg1[%c0, %c0_0] : memref<32x1xi32, #tpu.memory_space<vmem>>, vector<32x1xi32>
    %2 = vector.broadcast %1 : vector<32x1xi32> to vector<32x56xi32>
    %3 = arith.cmpi eq, %2, %0 : vector<32x56xi32>
    %cst = arith.constant 1.000000e+00 : f32
    %cst_1 = arith.constant 0.000000e+00 : f32
    %4 = vector.broadcast %cst : f32 to vector<32x56xf32>
    %5 = vector.broadcast %cst_1 : f32 to vector<32x56xf32>
    %6 = arith.select %3, %4, %5 : vector<32x56xi1>, vector<32x56xf32>
    %c0_2 = arith.constant 0 : index
    %c0_3 = arith.constant 0 : index
    %7 = vector.load %arg2[%c0_2, %c0_3] : memref<56x16xf32, #tpu.memory_space<vmem>>, vector<56x16xf32>
    %cst_4 = arith.constant dense<0.000000e+00> : vector<32x16xf32>
    %8 = tpu.matmul %6, %7, %cst_4 {dimension_numbers = #tpu.dot_dimension_numbers<[1], [0], [0], [1], [0, 0, 1, 1], [], []>} : vector<32x56xf32>, vector<56x16xf32>, vector<32x16xf32> -> vector<32x16xf32>
    %9 = vector.shape_cast %8 : vector<32x16xf32> to vector<2x16x16xf32>
    %10 = vector.extract_strided_slice %9 {offsets = [0, 0, 0], sizes = [2, 8, 16], strides = [1, 1, 1]} : vector<2x16x16xf32> to vector<2x8x16xf32>
    %11 = vector.extract_strided_slice %9 {offsets = [0, 1, 0], sizes = [2, 8, 16], strides = [1, 1, 1]} : vector<2x16x16xf32> to vector<2x8x16xf32>
    %12 = vector.extract_strided_slice %9 {offsets = [0, 2, 0], sizes = [2, 8, 16], strides = [1, 1, 1]} : vector<2x16x16xf32> to vector<2x8x16xf32>
    %13 = vector.extract_strided_slice %9 {offsets = [0, 3, 0], sizes = [2, 8, 16], strides = [1, 1, 1]} : vector<2x16x16xf32> to vector<2x8x16xf32>
    %14 = tpu.concatenate %10, %11, %12, %13 in 2 : vector<2x8x16xf32>, vector<2x8x16xf32>, vector<2x8x16xf32>, vector<2x8x16xf32> -> vector<2x8x64xf32>
    %15 = vector.shape_cast %14 : vector<2x8x64xf32> to vector<16x64xf32>
    %c0_5 = arith.constant 0 : index
    %c0_6 = arith.constant 0 : index
    %16 = vector.load %arg3[%c0_5, %c0_6] : memref<64x128xf32, #tpu.memory_space<vmem>>, vector<64x128xf32>
    %cst_7 = arith.constant dense<0.000000e+00> : vector<16x128xf32>
    %17 = tpu.matmul %15, %16, %cst_7 {dimension_numbers = #tpu.dot_dimension_numbers<[1], [0], [0], [1], [0, 0, 1, 1], [], []>} : vector<16x64xf32>, vector<64x128xf32>, vector<16x128xf32> -> vector<16x128xf32>
    %c0_8 = arith.constant 0 : index
    %c0_9 = arith.constant 0 : index
    %18 = vector.load %arg4[%c0_8, %c0_9] : memref<1x128xf32, #tpu.memory_space<vmem>>, vector<1x128xf32>
    %19 = vector.broadcast %18 : vector<1x128xf32> to vector<16x128xf32>
    %20 = arith.addf %17, %19 : vector<16x128xf32>
    %c0_10 = arith.constant 0 : index
    %c0_11 = arith.constant 0 : index
    %21 = vector.load %arg5[%c0_10, %c0_11] : memref<16x128xf32, #tpu.memory_space<vmem>>, vector<16x128xf32>
    tpu.vector_store %arg5[%c0_10, %c0_11], %20 {strides = array<i32>} : memref<16x128xf32, #tpu.memory_space<vmem>>, vector<16x128xf32>,
    return
  }
  func.func @transform_0(%arg0: i32) -> (i32, i32) {
    %c0_i32 = arith.constant 0 : i32
    %c0_i32_0 = arith.constant 0 : i32
    return %arg0, %c0_i32 : i32, i32
  }
  func.func @transform_1(%arg0: i32) -> (i32, i32) {
    %c0_i32 = arith.constant 0 : i32
    %c0_i32_0 = arith.constant 0 : i32
    %c0_i32_1 = arith.constant 0 : i32
    return %c0_i32, %c0_i32_0 : i32, i32
  }
  func.func @transform_2(%arg0: i32) -> (i32, i32) {
    %c0_i32 = arith.constant 0 : i32
    %c0_i32_0 = arith.constant 0 : i32
    %c0_i32_1 = arith.constant 0 : i32
    return %c0_i32, %c0_i32_0 : i32, i32
  }
  func.func @transform_3(%arg0: i32) -> (i32, i32) {
    %c0_i32 = arith.constant 0 : i32
    %c0_i32_0 = arith.constant 0 : i32
    %c0_i32_1 = arith.constant 0 : i32
    return %c0_i32, %c0_i32_0 : i32, i32
  }
  func.func @transform_4(%arg0: i32) -> (i32, i32) {
    %c0_i32 = arith.constant 0 : i32
    %c0_i32_0 = arith.constant 0 : i32
    return %arg0, %c0_i32 : i32, i32
  }
}

</mosaic_0001>

<bundles_post_ra>
// kernel: tpu_custom_call.1
= control target key start
LH: loop header
LB: loop body
LE: loop exit
PB: predicated region body
PF: predicated region fallthrough
CT: control target
= control target key end

     0   :  { %v445_v2 = vmov 0   ;;  %s556_s0 = inlined_call_operand.vmem [shape: s32[32,1], index: 0, kind: input, shape index: {}]   ;;  %s557_s1 = inlined_call_operand.vmem [shape: f32[56,16], index: 1, kind: input, shape index: {}]   ;;  %s558_s2 = inlined_call_operand.vmem [shape: f32[64,128], index: 2, kind: input, shape index: {}]   ;;  %s559_s3 = inlined_call_operand.vmem [shape: f32[1,128], index: 3, kind: input, shape index: {}]   ;;  %s560_s4 = inlined_call_operand.hbm [shape: f32[16,128], index: 4, kind: output, shape index: {}]  }
   0x1   :  { %v22_v0 = vld [vmem:[%s556_s0 + $0x10] sm:$0xff]  ;;  %v20_v1 = vld [vmem:[%s556_s0] sm:$0xff]  ;;  %420 = vset.pattern.permute.xlu1 %v445_v2  ;;  %419 = vset.pattern.permute.xlu0 %v445_v2  ;;  %v23_v3 = vld [vmem:[%s556_s0 + $0x18] sm:$0xff] }
   0x2   :  { %v44_v4 = vld [vmem:[%s557_s1] sm:$0xff]  ;;  %v45_v5 = vld [vmem:[%s557_s1 + $0x8] sm:$0xff]  ;;  %31 = vperm.xlu1 %420, %v22_v0   ;;  %25 = vperm.xlu0 %419, %v20_v1   ;;  %v46_v8 = vld [vmem:[%s557_s1 + $0x10] sm:$0xff] }
   0x3   :  { %v21_v6 = vld [vmem:[%s556_s0 + $0x8] sm:$0xff]  ;;  %v383_v7 = vpack.c.bf16 %v45_v5, %v44_v4  ;;  %v47_v9 = vld [vmem:[%s557_s1 + $0x18] sm:$0xff]  ;;  %v48_v11 = vld [vmem:[%s557_s1 + $0x20] sm:$0xff] }
   0x4   :  { %v387_v10 = vpack.c.bf16 %v47_v9, %v46_v8  ;;  %v49_v12 = vld [vmem:[%s557_s1 + $0x28] sm:$0xff] }
   0x5   :  { %9 = vsyncpa [#allocation3], 0  ;;  %384 = vmatprep.subr.bf16.mxu0 %v383_v7  ;;  %v391_v13 = vpack.c.bf16 %v49_v12, %v48_v11  ;;  %v50_v14 = vld [vmem:[%s557_s1 + $0x30] sm:$0xff]  ;;  %v18_v15 = vlaneseq  ;;  %vm51_vm0 = vcmask 457728   ;;  %v446_v19 = vmov 0.0   ;;  %v201_v26 = vld [vmem:[%s558_s2] sm:$0xff] }
   0x6   :  { %386 = vmatpush3.bf16.msra.mxu0 %v383_v7  ;;  %34 = vperm.xlu1 %420, %v23_v3   ;;  %v202_v27 = vld [vmem:[%s558_s2 + $0x8] sm:$0xff]  ;;  %v203_v29 = vld [vmem:[%s558_s2 + $0x10] sm:$0xff]  ;;  %v204_v30 = vld [vmem:[%s558_s2 + $0x18] sm:$0xff]  ;;  %vm153_vm5 = vcmask 1046528   ;;  %vm166_vm6 = vcmask 1045504   ;;  %vm179_vm7 = vcmask 1044480  }
   0x7   :  { %28 = vperm.xlu0 %419, %v21_v6   ;;  %388 = vmatprep.subr.bf16.mxu0 %v387_v10  ;;  %v19_v16 = vand.u32 127, %v18_v15  ;;  %v395_v28 = vpack.c.bf16 %v202_v27, %v201_v26  ;;  %v399_v31 = vpack.c.bf16 %v204_v30, %v203_v29  ;;  %v205_v32 = vld [vmem:[%s558_s2 + $0x20] sm:$0xff]  ;;  %v206_v33 = vld [vmem:[%s558_s2 + $0x28] sm:$0xff]  ;;  %v207_v35 = vld [vmem:[%s558_s2 + $0x30] sm:$0xff]  ;;  %s448_s25 = smov 32   ;;  %s449_s26 = smov 48  }
   0x8   :  { %v403_v34 = vpack.c.bf16 %v206_v33, %v205_v32  ;;  %v208_v36 = vld [vmem:[%s558_s2 + $0x38] sm:$0xff]  ;;  %s447_s2 = smov 16   ;;  %vm192_vm8 = vcmask 130048   ;;  %vm195_vm9 = vcmask 261120   ;;  %vm198_vm10 = vcmask 392192   ;;  %s450_s29 = smov [#allocation2]  }
   0x9   :  { %396 = vmatprep.subr.bf16.mxu1 %v395_v28  ;;  %v407_v37 = vpack.c.bf16 %v208_v36, %v207_v35  ;;  %vm216_vm11 = vcmask 523264   ;;  %v320_v8 = vld [vmem:[%s559_s3] ss:$0 sm:$0xff]  ;;  %s305_s30 = sshll.u32 %s450_s29, 4  ;;  %s306_s30 = int_to_ptr.vmem [resolvable:$true] %s305_s30 }
   0xa   :  { %390 = vmatpush3.bf16.msra.mxu0 %v387_v10  ;;  %398 = vmatpush3.bf16.msra.mxu1 %v395_v28  ;;  %s421_s5 = scalar_lea.vmem %s306_s30, 256  ;;  %p426_p1 = scmp.lt.s32.totalorder %s306_s30, %s306_s30 }
   0xb   :  { %392 = vmatprep.subr.bf16.mxu0 %v391_v13  ;;  %400 = vmatprep.subr.bf16.mxu1 %v399_v31  ;;  %p422_p0 = scmp.ne.s32.totalorder %s306_s30, %s421_s5  ;;  %p427_p2 = scmp.lt.s32.totalorder %s421_s5, %s421_s5 }
   0xd   :  { %p428_p3 = por %p427_p2, %p426_p1 }
   0xe   :  { %394 = vmatpush3.bf16.msra.mxu0 %v391_v13  ;;  %402 = vmatpush3.bf16.msra.mxu1 %v399_v31 }
   0xf   :  { %356 = vmatprep.subr.mxu0 %v50_v14  ;;  %404 = vmatprep.subr.bf16.mxu1 %v403_v34  ;;  %p429_p4 = pnand %p428_p3, %p422_p0 }
  0x12   :  { %357 = vmatpush3.msra.mxu0 %v50_v14  ;;  %406 = vmatpush3.bf16.msra.mxu1 %v403_v34 }
  0x13   :  { %408 = vmatprep.subr.bf16.mxu1 %v407_v37 }
  0x16   :  { %410 = vmatpush3.bf16.msra.mxu1 %v407_v37 }
  0x81   :  { %v32_v17 = vpop.permute.xlu1 %31  ;;  %v26_v18 = vpop.permute.xlu0 %25 }
  0x82   :  { %vm36_vm1 = vcmp.eq.s32.totalorder %v26_v18, %v19_v16  ;;  %vm38_vm2 = vcmp.eq.s32.totalorder %v32_v17, %v19_v16 }
  0x83   :  { %v40_v20 = vsel %vm36_vm1, 1.0, %v446_v19  ;;  %v42_v23 = vsel %vm38_vm2, 1.0, %v446_v19 }
  0x84   :  { %358 = vmatprep.mubr.msk.f32.mxu0 %vm51_vm0, %v40_v20 }
  0x85   :  { %v35_v21 = vpop.permute.xlu1 %34 }
  0x86   :  { %v29_v22 = vpop.permute.xlu0 %28  ;;  %vm39_vm4 = vcmp.eq.s32.totalorder %v35_v21, %v19_v16 }
  0x87   :  { %vm37_vm3 = vcmp.eq.s32.totalorder %v29_v22, %v19_v16  ;;  %v43_v25 = vsel %vm39_vm4, 1.0, %v446_v19 }
  0x88   :  { %v41_v24 = vsel %vm37_vm3, 1.0, %v446_v19 }
  0x89   :  { %359 = vmatmul.mubr.msk.f32.vlgmr.msra.gmra.mrb[0].mxu0 %vm51_vm0, %v41_v24 }
  0x8a   :  { %361 = vmatprep.mubr.msk.f32.mxu0 %vm51_vm0, %v42_v23 }
  0x8d   :  { %362 = vmatmul.mubr.msk.f32.gmra.mrb[2].mxu0 %vm51_vm0, %v43_v25 }
 0x15c   :  { %v360_v38 = vpop.f32.mrb[0].mxu0 }
 0x15d   :  { %v155_v39 = vrot.slane %v360_v38, 1  ;;  %v168_v40 = vrot.slane %v360_v38, 2  ;;  %v181_v41 = vrot.slane %v360_v38, 3  ;;  %v130_v42 = vpop.f32.mrb[1].mxu0 }
 0x15e   :  { %v154_v43 = vrot.slane %v130_v42, 1  ;;  %v167_v44 = vrot.slane %v130_v42, 2  ;;  %v180_v45 = vrot.slane %v130_v42, 3 }
 0x160   :  { %v363_v46 = vpop.f32.mrb[2].mxu0  ;;  %v156_v47 = vsel %vm153_vm5, %v154_v43, %v155_v39  ;;  %v169_v48 = vsel %vm166_vm6, %v167_v44, %v168_v40  ;;  %v182_v49 = vsel %vm179_vm7, %v180_v45, %v181_v41 }
 0x161   :  { %v158_v50 = vrot.slane %v363_v46, 1  ;;  %v171_v51 = vrot.slane %v363_v46, 2  ;;  %v184_v52 = vrot.slane %v363_v46, 3  ;;  %160 = vrot.lane.b32.xlu0 %v156_v47, %s447_s2  ;;  %v140_v53 = vpop.f32.mrb[3].mxu0 }
 0x162   :  { %v157_v54 = vrot.slane %v140_v53, 1  ;;  %v170_v55 = vrot.slane %v140_v53, 2  ;;  %v183_v56 = vrot.slane %v140_v53, 3 }
 0x164   :  { %v159_v57 = vsel %vm153_vm5, %v157_v54, %v158_v50  ;;  %v172_v58 = vsel %vm166_vm6, %v170_v55, %v171_v51  ;;  %v185_v59 = vsel %vm179_vm7, %v183_v56, %v184_v52 }
 0x165   :  { %173 = vrot.lane.b32.xlu0 %v169_v48, %s448_s25  ;;  %162 = vrot.lane.b32.xlu1 %v159_v57, %s447_s2 }
 0x169   :  { %186 = vrot.lane.b32.xlu0 %v182_v49, %s449_s26  ;;  %175 = vrot.lane.b32.xlu1 %v172_v58, %s448_s25 }
 0x16d   :  { %188 = vrot.lane.b32.xlu1 %v185_v59, %s449_s26 }
 0x1d3   :  { %v161_v60 = vpop.permute.xlu0 %160 }
 0x1d4   :  { %v193_v63 = vsel %vm192_vm8, %v130_v42, %v161_v60 }
 0x1d7   :  { %v174_v61 = vpop.permute.xlu0 %173  ;;  %v163_v62 = vpop.permute.xlu1 %162 }
 0x1d8   :  { %v196_v0 = vsel %vm195_vm9, %v193_v63, %v174_v61  ;;  %v194_v4 = vsel %vm192_vm8, %v140_v53, %v163_v62 }
 0x1db   :  { %v187_v1 = vpop.permute.xlu0 %186  ;;  %v176_v2 = vpop.permute.xlu1 %175 }
 0x1dc   :  { %v199_v3 = vsel %vm198_vm10, %v196_v0, %v187_v1  ;;  %v197_v5 = vsel %vm195_vm9, %v194_v4, %v176_v2 }
 0x1dd   :  { %380 = vmatprep.mubr.msk.f32.mxu1 %vm216_vm11, %v199_v3 }
 0x1df   :  { %v189_v6 = vpop.permute.xlu1 %188 }
 0x1e0   :  { %v200_v7 = vsel %vm198_vm10, %v197_v5, %v189_v6 }
 0x1e1   :  { %381 = vmatmul.mubr.msk.f32.vlgmr.msra.gmra.mrb[0].mxu1 %vm216_vm11, %v200_v7 }
 0x2b4   :  { %v382_v9 = vpop.f32.mrb[0].mxu1 }
 0x2b5   :  { %v295_v10 = vadd.f32 %v382_v9, %v320_v8  ;;  %v289_v11 = vpop.f32.mrb[1].mxu1 }
 0x2b6   :  { %v290_v12 = vadd.f32 %v320_v8, %v289_v11 }
 0x2b7   :  { %299 = vst [vmem:[#allocation2 + $0x8] sm:$0xff] %v295_v10 }
 0x2b8   :  { %298 = vst [vmem:[#allocation2] sm:$0xff] %v290_v12 }
 0x2b9   :  { %432 = shalt.err (!%p429_p4)
}
 0x2ba   :  { %s433_s3 = scalar_lea.hbm %s560_s4, 256 }
 0x2bb   :  { %p434_p5 = scmp.ne.s32.totalorder %s560_s4, %s433_s3  ;;  %p437_p6 = scmp.lt.u32.totalorder %s433_s3, %s560_s4 }
 0x2bd   :  { %p439_p7 = pnand %p437_p6, %p434_p5 }
 0x2bf   :  { %442 = shalt.err (!%p439_p7)
}
 0x2c0   :  { %s451_s10 = smov 128   ;;  %s452_s11 = smov 8  }
 0x2c1   :  { %311 = dma.vmem_to_hbm [thread:$0]  %s306_s30, 256, %s560_s4, [#allocation3], %s451_s10, %s451_s10, %s452_s11  }
 0x2c2   :  { %443 = dma.done.wait [#allocation3], 256  }
 0x2c3   :  { %444 = vsyncadd [#allocation3], 4294967040 }
 0x2c4   :  { %315 = vsyncpa [#allocation3], 1 }

</bundles_post_ra>
